<compile_context>
chip_gen: v6e
topology: v6e:2x2x1
jax: 0.10.0
libtpu: 0.0.40
codegen_flags: <defaults>
</compile_context>

<pallas_src>
import functools

import numpy as np
import jax
import jax.numpy as jnp
from jax.experimental import pallas as pl
from jax.experimental.pallas import tpu as pltpu


# ----------------------------------------------------------------------------
# Host-side helpers (deterministic glue; no learned parameters).
# ----------------------------------------------------------------------------
def _round_up(x: int, m: int) -> int:
    return ((x + m - 1) // m) * m


@functools.lru_cache(maxsize=None)
def _adaptive_avg_pool_matrix(in_len: int, out_len: int) -> np.ndarray:
    """(in_len, out_len) matrix W s.t. x @ W == adaptive_avg_pool1d(x, out_len)."""
    w = np.zeros((in_len, out_len), dtype=np.float32)
    for j in range(out_len):
        start = (j * in_len) // out_len
        end = -((-(j + 1) * in_len) // out_len)  # ceil((j+1)*L/O)
        w[start:end, j] = 1.0 / float(end - start)
    return w


@functools.lru_cache(maxsize=None)
def _stacked_pool_matrices(dims: tuple, output_dim: int, d_pad: int,
                           o_pad: int) -> np.ndarray:
    """(F, d_pad, o_pad) stack of per-feature averaging matrices (zero padded)."""
    ws = np.zeros((len(dims), d_pad, o_pad), dtype=np.float32)
    for k, d in enumerate(dims):
        ws[k, :d, :output_dim] = _adaptive_avg_pool_matrix(d, output_dim)
    return ws


def _pick_tm(b: int, d_pad: int, o_pad: int,
             budget_bytes: int = 24 * 1024 * 1024) -> int:
    """Batch-tile size: MXU-friendly, double-buffered footprint under budget."""
    tm = min(256, _round_up(b, 8))
    while tm > 8:
        footprint = 2 * 4 * (tm * d_pad + d_pad * o_pad + tm * o_pad)
        if footprint <= budget_bytes:
            break
        tm //= 2
    return max(8, _round_up(tm, 8))


# ----------------------------------------------------------------------------
# Pallas kernel: one (feature, batch-tile) grid cell = one MXU matmul tile.
# ----------------------------------------------------------------------------
def _fused_pool_kernel(x_ref, w_ref, o_ref):
    # x_ref: (TM, D_pad), w_ref: (D_pad, O_pad), o_ref: (TM, O_pad)
    o_ref[...] = jnp.dot(
        x_ref[...], w_ref[...], preferred_element_type=jnp.float32
    ).astype(o_ref.dtype)


def preprocessing_pallas(features, output_dim: int) -> jax.Array:
    """Pallas equivalent of Preprocessing.forward.

    features: list of arrays; features[i] has shape (B, ...) and flattens to
    (B, D_i). Returns (B, len(features), output_dim) float32.
    """
    num_f = len(features)
    b = features[0].shape[0]

    flats = [f.reshape(f.shape[0], -1).astype(jnp.float32) for f in features]
    dims = tuple(int(x.shape[1]) for x in flats)

    d_pad = _round_up(max(dims), 128)
    o_pad = _round_up(output_dim, 128)
    tm = _pick_tm(b, d_pad, o_pad)
    b_pad = _round_up(b, tm)
    nb = b_pad // tm

    # Stack + zero-pad inputs to (F, B_pad, D_pad). Zero columns in x match the
    # zero rows in W, so the pooled result is exact.
    x_stacked = jnp.stack(
        [jnp.pad(x, ((0, b_pad - b), (0, d_pad - x.shape[1]))) for x in flats],
        axis=0,
    )
    # (F, D_pad, O_pad) averaging matrices, cached on the host per shape-set.
    w_stacked = jnp.asarray(_stacked_pool_matrices(dims, output_dim, d_pad, o_pad))

    cost = pl.CostEstimate(
        flops=2 * num_f * b_pad * d_pad * o_pad,
        transcendentals=0,
        bytes_accessed=4 * (num_f * b_pad * d_pad
                            + num_f * d_pad * o_pad
                            + b_pad * num_f * o_pad),
    )

    # Output is a lane-dense (B_pad, F*O_pad) slab; block (TM, O_pad) indexed by
    # (batch_tile, feature) so each grid cell writes its final-layout tile.
    out = pl.pallas_call(
        _fused_pool_kernel,
        out_shape=jax.ShapeDtypeStruct((b_pad, num_f * o_pad), jnp.float32),
        grid_spec=pltpu.PrefetchScalarGridSpec(
            num_scalar_prefetch=0,
            grid=(num_f, nb),  # feature outer -> W stays VMEM-resident over batch tiles
            in_specs=[
                pl.BlockSpec((None, tm, d_pad), lambda f, i: (f, i, 0)),
                pl.BlockSpec((None, d_pad, o_pad), lambda f, i: (f, 0, 0)),
            ],
            out_specs=pl.BlockSpec((tm, o_pad), lambda f, i: (i, f)),
        ),
        compiler_params=pltpu.CompilerParams(
            dimension_semantics=("parallel", "parallel"),
            vmem_limit_bytes=32 * 1024 * 1024,
        ),
        cost_estimate=cost,
    )(x_stacked, w_stacked)

    # Free (metadata) reshape, then strip padding.
    out = out.reshape(b_pad, num_f, o_pad)
    return out[:b, :, :output_dim]


# ----------------------------------------------------------------------------
# Pure-JAX reference (same math, no Pallas) for correctness checking.
# ----------------------------------------------------------------------------
def _reference(features, output_dim):
    outs = []
    for f in features:
        b = f.shape[0]
        x = f.reshape(b, -1).astype(jnp.float32)
        w = jnp.asarray(_adaptive_avg_pool_matrix(int(x.shape[1]), output_dim))
        outs.append(x @ w)
    return jnp.stack(outs, axis=1)


if __name__ == "__main__":
    key = jax.random.PRNGKey(0)
    B = 8
    output_dim = 128
    # Two backbone feature maps; second is (B, C, W) to exercise the flatten.
    k0, k1 = jax.random.split(key, 2)
    features = [
        jax.random.normal(k0, (B, 192), dtype=jnp.float32),
        jax.random.normal(k1, (B, 4, 96), dtype=jnp.float32),
    ]

    out = preprocessing_pallas(features, output_dim)
    out = jax.block_until_ready(out)

    ref = _reference(features, output_dim)
    assert out.shape == (B, len(features), output_dim), out.shape
    assert jnp.allclose(out, ref, atol=1e-5, rtol=1e-5)

    print("KERNEL_OK")
</pallas_src>

<mosaic_0001>
module attributes {stable_mosaic.version = 11 : i64} {
  func.func @_fused_pool_kernel(%arg0: i32, %arg1: i32, %arg2: memref<1x8x384xf32, #tpu.memory_space<vmem>>, %arg3: memref<1x384x128xf32, #tpu.memory_space<vmem>>, %arg4: memref<8x128xf32, #tpu.memory_space<vmem>>) attributes {dimension_semantics = [#tpu.dimension_semantics<parallel>, #tpu.dimension_semantics<parallel>], iteration_bounds = array<i64: 2, 1>, scalar_prefetch = 0 : i64, scratch_operands = 0 : i64, tpu.core_type = #tpu.core_type<tc>, window_params = [{transform_indices = @transform_0, window_bounds = array<i64: 1, 8, 384>}, {transform_indices = @transform_1, window_bounds = array<i64: 1, 384, 128>}, {transform_indices = @transform_2, window_bounds = array<i64: 8, 128>}]} {
    %c0 = arith.constant 0 : index
    %c0_0 = arith.constant 0 : index
    %c0_1 = arith.constant 0 : index
    %0 = vector.load %arg2[%c0, %c0_0, %c0_1] : memref<1x8x384xf32, #tpu.memory_space<vmem>>, vector<1x8x384xf32>
    %1 = vector.shape_cast %0 : vector<1x8x384xf32> to vector<8x384xf32>
    %c0_2 = arith.constant 0 : index
    %c0_3 = arith.constant 0 : index
    %c0_4 = arith.constant 0 : index
    %2 = vector.load %arg3[%c0_2, %c0_3, %c0_4] : memref<1x384x128xf32, #tpu.memory_space<vmem>>, vector<1x384x128xf32>
    %3 = vector.shape_cast %2 : vector<1x384x128xf32> to vector<384x128xf32>
    %cst = arith.constant dense<0.000000e+00> : vector<8x128xf32>
    %4 = tpu.matmul %1, %3, %cst {dimension_numbers = #tpu.dot_dimension_numbers<[1], [0], [0], [1], [0, 0, 1, 1], [], []>} : vector<8x384xf32>, vector<384x128xf32>, vector<8x128xf32> -> vector<8x128xf32>
    %c0_5 = arith.constant 0 : index
    %c0_6 = arith.constant 0 : index
    %5 = vector.load %arg4[%c0_5, %c0_6] : memref<8x128xf32, #tpu.memory_space<vmem>>, vector<8x128xf32>
    tpu.vector_store %arg4[%c0_5, %c0_6], %4 {strides = array<i32>} : memref<8x128xf32, #tpu.memory_space<vmem>>, vector<8x128xf32>,
    return
  }
  func.func @transform_0(%arg0: i32, %arg1: i32) -> (i32, i32, i32) {
    %c0_i32 = arith.constant 0 : i32
    %c0_i32_0 = arith.constant 0 : i32
    return %arg0, %arg1, %c0_i32 : i32, i32, i32
  }
  func.func @transform_1(%arg0: i32, %arg1: i32) -> (i32, i32, i32) {
    %c0_i32 = arith.constant 0 : i32
    %c0_i32_0 = arith.constant 0 : i32
    %c0_i32_1 = arith.constant 0 : i32
    return %arg0, %c0_i32, %c0_i32_0 : i32, i32, i32
  }
  func.func @transform_2(%arg0: i32, %arg1: i32) -> (i32, i32) {
    %c0_i32 = arith.constant 0 : i32
    return %arg1, %arg0 : i32, i32
  }
}

</mosaic_0001>

<bundles_post_ra>
// kernel: tpu_custom_call.1
= control target key start
LH: loop header
LB: loop body
LE: loop exit
PB: predicated region body
PF: predicated region fallthrough
CT: control target
= control target key end

     0   :  { %7 = vsyncpa [#allocation3], 0  ;;  %s1107_s0 = inlined_call_operand.hbm [shape: f32[2,8,384], index: 0, kind: input, shape index: {}]   ;;  %s1108_s1 = inlined_call_operand.hbm [shape: f32[2,384,128], index: 1, kind: input, shape index: {}]   ;;  %s1109_s2 = inlined_call_operand.hbm [shape: f32[8,256], index: 2, kind: output, shape index: {}]  }
   0x1   :  { %9 = vsyncpa [#allocation3 + $0x1], 0 }
   0x2   :  { %10 = vsyncpa [#allocation6], 0 }
   0x3   :  { %12 = vsyncpa [#allocation6 + $0x1], 0 }
   0x4   :  { %13 = vsyncpa [#allocation4], 0 }
   0x5   :  { %15 = vsyncpa [#allocation4 + $0x1], 0  ;;  %s872_s9 = smov 0   ;;  %s874_s10 = smov 0  }
   0x6   :  { %s876_s11 = smov 0   ;;  %s878_s12 = smov 0  }
   0x7   :  { %s880_s13 = smov 0   ;;  %s882_s14 = smov 0  }
   0x8 LB: > { %s532_s15 = sadd.s32 4294967295, %s848_s14   ;;  %s533_s16 = sadd.s32 4294967294, %s848_s14   ;;  %s848_s14 = sphi %s882_s14, %s21_s14   ;;  %s844_s13 = sphi %s880_s13, %s1121_s13   ;;  %s840_s12 = sphi %s878_s12, %s1120_s12   ;;  %s836_s11 = sphi %s876_s11, %s1119_s11   ;;  %s832_s10 = sphi %s874_s10, %s1118_s10   ;;  %s828_s9 = sphi %s872_s9, %s1117_s9  }
   0x9   : > { %s33_s17 = sadd.s32 1, %s844_s13  ;;  %s42_s18 = sadd.s32 1, %s836_s11 }
   0xa   : > { %p35_p0 = scmp.ge.s32.totalorder %s33_s17, 2  ;;  %p49_p1 = scmp.ne.s32.totalorder %s836_s11, %s832_s10 }
   0xb   : > { %p50_p2 = scmp.eq.s32.totalorder %s848_s14, 0  ;;  %p55_p3 = scmp.ne.s32.totalorder %s832_s10, %s828_s9 }
   0xc   : > { %s1123_s17 = smov (%p35_p0, %s33_s17), 0  ;;  %p56_p5 = scmp.eq.s32.totalorder %s532_s15, 0 }
   0xd   : > { %p913_p4 = por %p50_p2, %p49_p1  ;;  %s37_s20 = ssub.s32 %s844_s13, %s1123_s17 }
   0xe   : > { %p107_p6 = scmp.eq.s32.totalorder %s532_s15, 1  ;;  %p40_p7 = scmp.eq.s32.totalorder %s37_s20, 0 }
   0xf   : > { %p919_p8 = por %p56_p5, %p55_p3  ;;  %p113_p10 = scmp.eq.s32.totalorder %s533_s16, 1 }
  0x10   : > { %p923_p9 = por %p107_p6, %p49_p1  ;;  %p654_p13 = scmp.lt.s32.totalorder %s848_s14, 2 }
  0x11   : > { %s928_s23 = scalar_select %p40_p7, %s836_s11, %s42_s18  }
  0x12   : > { %p930_p11 = por %p113_p10, %p55_p3  ;;  %s937_s25 = sand.u32 1, %s836_s11  }
  0x13   : > { %s631_s26 = smul.u32 24, %s937_s25  ;;  %p943_p0 = pnand %p654_p13, %p913_p4 }
  0x14   : > { %s632_s27 = smul.u32 384, %s844_s13  ;;  %p538_p1 = scmp.ge.s32.totalorder %s848_s14, 1 }
  0x15   : > { %s137_s4 = scalar_lea.vmem [#allocation2], %s631_s26  ;;  %s134_s6 = scalar_lea.sflag [#allocation3], %s937_s25 }
  0x16   : > { %s145_s3 = scalar_lea.hbm %s1107_s0, %s632_s27  ;;  %s147_s5 = sshll.u32 %s137_s4, 4  ;;  %s148_s5 = int_to_ptr.vmem [resolvable:$true] %s147_s5 }
  0x17   : > { %p710_p2 = pneg %p943_p0  ;;  %s721_s7 = scalar_lea.vmem %s148_s5, 384 }
  0x18   : > { %p722_p3 = scmp.ne.s32.totalorder %s148_s5, %s721_s7  ;;  %s850_s8 = smov [#allocation2]  }
  0x19   : > { %s726_s15 = sshll.u32 %s850_s8, 4  ;;  %s727_s15 = int_to_ptr.vmem [resolvable:$false] %s726_s15 }
  0x1a   : > { %p724_p4 = pnand %p722_p3, %p710_p2  ;;  %s728_s16 = scalar_lea.vmem %s727_s15, 768 }
  0x1b   : > { %p729_p6 = scmp.lt.s32.totalorder %s148_s5, %s727_s15  ;;  %p730_p7 = scmp.lt.s32.totalorder %s728_s16, %s721_s7 }
  0x1c   : > { %p725_p5 = pneg %p724_p4 }
  0x1d   : > { %p731_p10 = por %p730_p7, %p729_p6 }
  0x1f   : > { %p732_p13 = pnand %p731_p10, %p725_p5 }
  0x21   : > { %735 = shalt.err (!%p732_p13)
}
  0x22   : > { %646 = dma.hbm_to_vmem [thread:$0]  (!%p943_p0), %s145_s3, 384, %s148_s5, %s134_s6  }
  0x23   : > { %p173_p3 = scmp.lt.s32.totalorder %s848_s14, 3  ;;  %s633_s18 = smul.u32 384, %s937_s25 }
  0x24   : > { %s634_s20 = smul.u32 6144, %s844_s13  ;;  %s155_s7 = scalar_lea.sflag [#allocation6], %s937_s25 }
  0x25   : > { %p963_p4 = pnand %p538_p1, %p173_p3  ;;  %s158_s30 = scalar_lea.vmem [#allocation5], %s633_s18 }
  0x26   : > { %s164_s29 = scalar_lea.hbm %s1108_s1, %s634_s20  ;;  %s165_s4 = sshll.u32 %s158_s30, 4  ;;  %s166_s4 = int_to_ptr.vmem [resolvable:$true] %s165_s4 }
  0x27   : > { %s749_s8 = scalar_lea.vmem %s166_s4, 6144  ;;  %s851_s3 = smov [#allocation5]  }
  0x28   : > { %p750_p5 = scmp.ne.s32.totalorder %s166_s4, %s749_s8  ;;  %s754_s5 = sshll.u32 %s851_s3, 4  ;;  %s755_s5 = int_to_ptr.vmem [resolvable:$false] %s754_s5 }
  0x29   : > { %s756_s6 = scalar_lea.vmem %s755_s5, 12288  ;;  %p757_p1 = scmp.lt.s32.totalorder %s166_s4, %s755_s5 }
  0x2a   : > { %p752_p6 = pnand %p750_p5, %p710_p2  ;;  %p758_p10 = scmp.lt.s32.totalorder %s756_s6, %s749_s8 }
  0x2c   : > { %p753_p7 = pneg %p752_p6  ;;  %p759_p13 = por %p758_p10, %p757_p1 }
  0x2e   : > { %p760_p3 = pnand %p759_p13, %p753_p7 }
  0x30   : > { %763 = shalt.err (!%p760_p3)
}
  0x31   : > { %s852_s15 = smov 128   ;;  %s853_s16 = smov 8  }
  0x32   : > { %649 = dma.hbm_to_vmem [thread:$0]  (!%p943_p0), %s164_s29, 6144, %s166_s4, %s155_s7, %s852_s15, %s852_s15, %s853_s16  }
  0x33   : > { %177 = sbr.rel (%p963_p4) target bundleno = 307 (0x133), region = 28  ;;  %s980_s25 = sand.u32 (!%p963_p4), 1, %s832_s10  }
  0x34   : > { %s635_s18 = smul.u32 (!%p963_p4), 24, %s980_s25  ;;  %s180_s20 = scalar_lea.sflag (!%p963_p4), [#allocation3], %s980_s25 }
  0x36   : > { %s984_s26 = scalar_lea.vmem (!%p963_p4), [#allocation2], %s635_s18 }
  0x38   : > { %815 = dma.done.wait (%p919_p8), %s180_s20, 384  }
  0x39   : > { %817 = vsyncadd (%p919_p8), %s180_s20, 4294966912  ;;  %s636_s28 = smul.u32 384, %s980_s25  ;;  %s189_s19 = scalar_lea.sflag [#allocation6], %s980_s25 }
  0x3b   : > { %s992_s27 = scalar_lea.vmem [#allocation5], %s636_s28 }
  0x3c   : > { %819 = dma.done.wait (%p919_p8), %s189_s19, 6144  }
  0x3d   : > { %821 = vsyncadd (%p919_p8), %s189_s19, 4294961152  ;;  %v854_v0 = vmov 0.0   ;;  %vm855_vm0 = vmmov 0   ;;  %v252_v1 = vld [vmem:[%s992_s27 + $0xf8] sm:$0xff]  ;;  %v251_v3 = vld [vmem:[%s992_s27 + $0xf0] sm:$0xff]  ;;  %s539_s21 = sshll.u32 %s980_s25, 3 }
  0x3e   : > { %596 = vmatprep.subr.mxu1 %v854_v0  ;;  %628 = vmatprep.mubr.msk.f32.mxu1 %vm855_vm0, %v854_v0  ;;  %v236_v2 = vld [vmem:[%s992_s27 + $0x78] sm:$0xff]  ;;  %v235_v4 = vld [vmem:[%s992_s27 + $0x70] sm:$0xff]  ;;  %v250_v6 = vld [vmem:[%s992_s27 + $0xe8] sm:$0xff]  ;;  %s541_s29 = sshll.u32 %s840_s12, 7  ;;  %s217_s30 = scalar_lea.vmem [#allocation7], %s539_s21 }
  0x3f   : > { %544 = vmatprep.subr.mxu0 %v252_v1  ;;  %v268_v5 = vld [vmem:[%s992_s27 + $0x178] sm:$0xff]  ;;  %v267_v7 = vld [vmem:[%s992_s27 + $0x170] sm:$0xff]  ;;  %v234_v8 = vld [vmem:[%s992_s27 + $0x68] sm:$0xff]  ;;  %s426_s4 = sshll.u32 %s217_s30, 4  ;;  %s424_s3 = scalar_lea.hbm %s1109_s2, %s541_s29  ;;  %s427_s4 = int_to_ptr.vmem [resolvable:$true] %s426_s4 }
  0x40   : > { %545 = vmatpush3.msra.mxu0 %v236_v2  ;;  %597 = vmatpush3.msra.mxu1 %v268_v5  ;;  %v266_v9 = vld [vmem:[%s992_s27 + $0x168] sm:$0xff]  ;;  %v249_v10 = vld [vmem:[%s992_s27 + $0xe0] sm:$0xff]  ;;  %v248_v13 = vld [vmem:[%s992_s27 + $0xd8] sm:$0xff]  ;;  %s411_s5 = scalar_lea.sflag [#allocation4], %s980_s25  ;;  %s764_s6 = scalar_lea.vmem %s427_s4, 128 }
  0x41   : > { %546 = vmatprep.subr.mxu0 %v251_v3  ;;  %598 = vmatprep.subr.mxu1 %v854_v0  ;;  %v233_v11 = vld [vmem:[%s992_s27 + $0x60] sm:$0xff]  ;;  %v232_v14 = vld [vmem:[%s992_s27 + $0x58] sm:$0xff]  ;;  %v247_v16 = vld [vmem:[%s992_s27 + $0xd0] sm:$0xff]  ;;  %p765_p8 = scmp.ne.s32.totalorder %s427_s4, %s764_s6  ;;  %s856_s15 = smov [#allocation7]  }
  0x42   : > { %547 = vmatpush3.msra.mxu0 %v235_v4  ;;  %599 = vmatpush3.msra.mxu1 %v267_v7  ;;  %v265_v12 = vld [vmem:[%s992_s27 + $0x160] sm:$0xff]  ;;  %v264_v15 = vld [vmem:[%s992_s27 + $0x158] sm:$0xff]  ;;  %v231_v17 = vld [vmem:[%s992_s27 + $0x50] sm:$0xff]  ;;  %s768_s16 = sshll.u32 %s856_s15, 4  ;;  %s769_s16 = int_to_ptr.vmem [resolvable:$false] %s768_s16 }
  0x43   : > { %548 = vmatprep.subr.mxu0 %v250_v6  ;;  %600 = vmatprep.subr.mxu1 %v854_v0  ;;  %v263_v18 = vld [vmem:[%s992_s27 + $0x150] sm:$0xff]  ;;  %v246_v19 = vld [vmem:[%s992_s27 + $0xc8] sm:$0xff]  ;;  %v245_v22 = vld [vmem:[%s992_s27 + $0xc0] sm:$0xff]  ;;  %p766_p0 = pnand %p765_p8, %p923_p9  ;;  %s770_s12 = scalar_lea.vmem %s769_s16, 256 }
  0x44   : > { %549 = vmatpush3.msra.mxu0 %v234_v8  ;;  %601 = vmatpush3.msra.mxu1 %v266_v9  ;;  %v230_v20 = vld [vmem:[%s992_s27 + $0x48] sm:$0xff]  ;;  %v229_v23 = vld [vmem:[%s992_s27 + $0x40] sm:$0xff]  ;;  %v244_v25 = vld [vmem:[%s992_s27 + $0xb8] sm:$0xff]  ;;  %p771_p4 = scmp.lt.s32.totalorder %s427_s4, %s769_s16  ;;  %p772_p5 = scmp.lt.s32.totalorder %s770_s12, %s764_s6 }
  0x45   : > { %550 = vmatprep.subr.mxu0 %v249_v10  ;;  %602 = vmatprep.subr.mxu1 %v854_v0  ;;  %v262_v21 = vld [vmem:[%s992_s27 + $0x148] sm:$0xff]  ;;  %v261_v24 = vld [vmem:[%s992_s27 + $0x140] sm:$0xff]  ;;  %v228_v26 = vld [vmem:[%s992_s27 + $0x38] sm:$0xff]  ;;  %p767_p2 = pneg %p766_p0 }
  0x46   : > { %551 = vmatpush3.msra.mxu0 %v233_v11  ;;  %603 = vmatpush3.msra.mxu1 %v265_v12  ;;  %v260_v27 = vld [vmem:[%s992_s27 + $0x138] sm:$0xff]  ;;  %v243_v28 = vld [vmem:[%s992_s27 + $0xb0] sm:$0xff]  ;;  %v242_v31 = vld [vmem:[%s992_s27 + $0xa8] sm:$0xff]  ;;  %p773_p6 = por %p772_p5, %p771_p4 }
  0x47   : > { %552 = vmatprep.subr.mxu0 %v248_v13  ;;  %604 = vmatprep.subr.mxu1 %v854_v0  ;;  %v227_v29 = vld [vmem:[%s992_s27 + $0x30] sm:$0xff]  ;;  %v226_v32 = vld [vmem:[%s992_s27 + $0x28] sm:$0xff]  ;;  %v241_v34 = vld [vmem:[%s992_s27 + $0xa0] sm:$0xff] }
  0x48   : > { %553 = vmatpush3.msra.mxu0 %v232_v14  ;;  %605 = vmatpush3.msra.mxu1 %v264_v15  ;;  %v259_v30 = vld [vmem:[%s992_s27 + $0x130] sm:$0xff]  ;;  %v258_v33 = vld [vmem:[%s992_s27 + $0x128] sm:$0xff]  ;;  %v225_v35 = vld [vmem:[%s992_s27 + $0x20] sm:$0xff]  ;;  %p774_p7 = pnand %p773_p6, %p767_p2 }
  0x49   : > { %554 = vmatprep.subr.mxu0 %v247_v16  ;;  %606 = vmatprep.subr.mxu1 %v854_v0  ;;  %v257_v36 = vld [vmem:[%s992_s27 + $0x120] sm:$0xff]  ;;  %v240_v37 = vld [vmem:[%s992_s27 + $0x98] sm:$0xff]  ;;  %v239_v40 = vld [vmem:[%s992_s27 + $0x90] sm:$0xff] }
  0x4a   : > { %555 = vmatpush3.msra.mxu0 %v231_v17  ;;  %607 = vmatpush3.msra.mxu1 %v263_v18  ;;  %v224_v38 = vld [vmem:[%s992_s27 + $0x18] sm:$0xff]  ;;  %v223_v41 = vld [vmem:[%s992_s27 + $0x10] sm:$0xff]  ;;  %v238_v43 = vld [vmem:[%s992_s27 + $0x88] sm:$0xff] }
  0x4b   : > { %556 = vmatprep.subr.mxu0 %v246_v19  ;;  %608 = vmatprep.subr.mxu1 %v854_v0  ;;  %v256_v39 = vld [vmem:[%s992_s27 + $0x118] sm:$0xff]  ;;  %v255_v42 = vld [vmem:[%s992_s27 + $0x110] sm:$0xff]  ;;  %v222_v44 = vld [vmem:[%s992_s27 + $0x8] sm:$0xff] }
  0x4c   : > { %557 = vmatpush3.msra.mxu0 %v230_v20  ;;  %609 = vmatpush3.msra.mxu1 %v262_v21  ;;  %v219_v45 = vld [vmem:[%s984_s26 + $0x8] sm:$0xff]  ;;  %v237_v46 = vld [vmem:[%s992_s27 + $0x80] sm:$0xff]  ;;  %v254_v47 = vld [vmem:[%s992_s27 + $0x108] sm:$0xff] }
  0x4d   : > { %558 = vmatprep.subr.mxu0 %v245_v22  ;;  %610 = vmatprep.subr.mxu1 %v854_v0  ;;  %v221_v48 = vld [vmem:[%s992_s27] sm:$0xff]  ;;  %v218_v49 = vld [vmem:[%s984_s26] sm:$0xff] }
  0x4e   : > { %559 = vmatpush3.msra.mxu0 %v229_v23  ;;  %611 = vmatpush3.msra.mxu1 %v261_v24  ;;  %v253_v50 = vld [vmem:[%s992_s27 + $0x100] sm:$0xff] }
  0x4f   : > { %560 = vmatprep.subr.mxu0 %v244_v25  ;;  %612 = vmatprep.subr.mxu1 %v854_v0  ;;  %v220_v51 = vld [vmem:[%s984_s26 + $0x10] sm:$0xff] }
  0x50   : > { %561 = vmatpush3.msra.mxu0 %v228_v26  ;;  %613 = vmatpush3.msra.mxu1 %v260_v27 }
  0x51   : > { %562 = vmatprep.subr.mxu0 %v243_v28  ;;  %614 = vmatprep.subr.mxu1 %v854_v0 }
  0x52   : > { %563 = vmatpush3.msra.mxu0 %v227_v29  ;;  %615 = vmatpush3.msra.mxu1 %v259_v30 }
  0x53   : > { %564 = vmatprep.subr.mxu0 %v242_v31  ;;  %616 = vmatprep.subr.mxu1 %v854_v0 }
  0x54   : > { %565 = vmatpush3.msra.mxu0 %v226_v32  ;;  %617 = vmatpush3.msra.mxu1 %v258_v33 }
  0x55   : > { %566 = vmatprep.subr.mxu0 %v241_v34  ;;  %618 = vmatprep.subr.mxu1 %v854_v0 }
  0x56   : > { %567 = vmatpush3.msra.mxu0 %v225_v35  ;;  %619 = vmatpush3.msra.mxu1 %v257_v36 }
  0x57   : > { %568 = vmatprep.subr.mxu0 %v240_v37  ;;  %620 = vmatprep.subr.mxu1 %v854_v0 }
  0x58   : > { %569 = vmatpush3.msra.mxu0 %v224_v38  ;;  %621 = vmatpush3.msra.mxu1 %v256_v39 }
  0x59   : > { %570 = vmatprep.subr.mxu0 %v239_v40  ;;  %622 = vmatprep.subr.mxu1 %v854_v0 }
  0x5a   : > { %571 = vmatpush3.msra.mxu0 %v223_v41  ;;  %623 = vmatpush3.msra.mxu1 %v255_v42 }
  0x5b   : > { %572 = vmatprep.subr.mxu0 %v238_v43  ;;  %624 = vmatprep.subr.mxu1 %v854_v0 }
  0x5c   : > { %573 = vmatpush3.msra.mxu0 %v222_v44  ;;  %333 = vmatprep.mubr.f32.mxu0 %v219_v45 }
  0x5d   : > { %574 = vmatprep.subr.mxu0 %v237_v46  ;;  %625 = vmatpush3.msra.mxu1 %v254_v47 }
  0x5e   : > { %575 = vmatpush3.msra.mxu0 %v221_v48  ;;  %626 = vmatprep.subr.mxu1 %v854_v0 }
  0x5f   : > { %334 = vmatmul.mubr.f32.vlgmr.msra.gmra.mxu0 %v218_v49  ;;  %627 = vmatpush3.msra.mxu1 %v253_v50 }
  0x60   : > { %629 = vmatmul.mubr.f32.vlgmr.msra.gmra.mxu1 %v220_v51 }
 0x11f   : > { %v576_v52 = vpop.f32.mrf.mxu0 }
 0x120   : > { %v405_v53 = vpop.f32.mrf.mxu1 }
 0x121   : > { %v577_v54 = vpop.f32.mrf.mxu0 }
 0x122   : > { %v578_v55 = vadd.f32 %v577_v54, %v576_v52  ;;  %v630_v56 = vpop.f32.mrf.mxu1 }
 0x124   : > { %v406_v57 = vadd.f32 %v578_v55, %v405_v53 }
 0x126   : > { %409 = vst [vmem:[%s217_s30] sm:$0xff] %v406_v57 }
 0x127   : > { %777 = shalt.err (!%p774_p7)
}
 0x128   : > { %s778_s18 = scalar_lea.hbm %s424_s3, 128  ;;  %s782_s26 = scalar_lea.hbm %s1109_s2, 256 }
 0x129   : > { %p779_p1 = scmp.ne.s32.totalorder %s424_s3, %s778_s18  ;;  %p783_p3 = scmp.lt.s32.totalorder %s424_s3, %s1109_s2 }
 0x12a   : > { %p784_p8 = scmp.lt.s32.totalorder %s782_s26, %s778_s18 }
 0x12b   : > { %p780_p10 = pnand %p779_p1, %p923_p9 }
 0x12c   : > { %p785_p0 = por %p784_p8, %p783_p3 }
 0x12d   : > { %p781_p13 = pneg %p780_p10 }
 0x12f   : > { %p786_p12 = pnand %p785_p0, %p781_p13 }
 0x131   : > { %789 = shalt.err (!%p786_p12)
}
 0x132   : > { %641 = dma.vmem_to_hbm [thread:$0]  (%p923_p9), %s427_s4, 128, %s424_s3, %s411_s5  }
 0x133 PF: > { %s438_s27 = sand.u32 1, %s828_s9   ;;  %p1116_p2 = scmp.ge.s32.totalorder %s848_s14, 2 }
 0x134   : > { %s439_s21 = scalar_lea.sflag [#allocation4], %s438_s27 }
 0x135   : > { %p651_p4 = pnand %p1116_p2, %p930_p11 }
 0x137   : > { %p652_p5 = pneg %p651_p4 }
 0x139   : > { %823 = dma.done.wait (%p652_p5), %s439_s21, 128  }
 0x13a   : > { %825 = vsyncadd (%p652_p5), %s439_s21, 4294967168  ;;  %s21_s14 = sadd.s32 1, %s848_s14   ;;  %s1117_s9 = smov %s832_s10 }
 0x13b   : > { %p18_p6 = scmp.ge.s32.totalorder %s21_s14, 4   ;;  %s1118_s10 = smov %s836_s11 }
 0x13c   : > { %s1119_s11 = smov %s928_s23  ;;  %s1120_s12 = smov %s844_s13 }
 0x13d   : > { %s1121_s13 = smov %s1123_s17  ;;  %20 = sbr.rel (!%p18_p6) target bundleno = 8 (0x8), region = 86 }
 0x142   :  { %444 = vsyncpa [#allocation3], 1 }
 0x143   :  { %446 = vsyncpa [#allocation3 + $0x1], 1 }
 0x144   :  { %447 = vsyncpa [#allocation6], 1 }
 0x145   :  { %449 = vsyncpa [#allocation6 + $0x1], 1 }
 0x146   :  { %450 = vsyncpa [#allocation4], 1 }
 0x147   :  { %452 = vsyncpa [#allocation4 + $0x1], 1 }

</bundles_post_ra>
